<compile_context>
chip_gen: v7x
topology: tpu7x:2x2x1
jax: 0.10.0
libtpu: 0.0.40
codegen_flags: <defaults>
</compile_context>

<pallas_src>
import jax
import jax.numpy as jnp
from jax.experimental import pallas as pl
from jax.experimental.pallas import tpu as pltpu

_TARGET_BLOCK_BYTES = 4 << 20        # ~4 MiB blocks
_VMEM_LIMIT_BYTES = 32 << 20         # safe on v5e/v6e/v7x (≥64 MiB physical)
_LANE = 128
_CHUNK_1D = 1024                     # 8 sublanes * 128 lanes


def _hsigmoid_kernel(x_ref, o_ref):
    # Compute in f32 regardless of storage dtype (free on the VPU; matches
    # PyTorch's float accumulation for half precision).
    x = x_ref[...].astype(jnp.float32)
    y = jnp.minimum(jnp.maximum(x + 3.0, 0.0), 6.0) * (1.0 / 6.0)
    o_ref[...] = y.astype(o_ref.dtype)


def _compiler_params():
    return pltpu.CompilerParams(
        dimension_semantics=("parallel",),
        vmem_limit_bytes=_VMEM_LIMIT_BYTES,
    )


def _cost(nelems, itemsize):
    return pl.CostEstimate(
        flops=4 * nelems, transcendentals=0,
        bytes_accessed=2 * nelems * itemsize)


def _run_2d(x2d, tile_rows, cols):
    rows = x2d.shape[0]
    return pl.pallas_call(
        _hsigmoid_kernel,
        out_shape=jax.ShapeDtypeStruct((rows, cols), x2d.dtype),
        grid_spec=pltpu.PrefetchScalarGridSpec(
            num_scalar_prefetch=0,
            grid=(pl.cdiv(rows, tile_rows),),
            in_specs=[pl.BlockSpec((tile_rows, cols), lambda i: (i, 0))],
            out_specs=pl.BlockSpec((tile_rows, cols), lambda i: (i, 0)),
        ),
        compiler_params=_compiler_params(),
        cost_estimate=_cost(x2d.size, x2d.dtype.itemsize),
    )(x2d)


def _run_1d(flat, tile):
    n = flat.shape[0]
    return pl.pallas_call(
        _hsigmoid_kernel,
        out_shape=jax.ShapeDtypeStruct((n,), flat.dtype),
        grid_spec=pltpu.PrefetchScalarGridSpec(
            num_scalar_prefetch=0,
            grid=(pl.cdiv(n, tile),),
            in_specs=[pl.BlockSpec((tile,), lambda i: (i,))],
            out_specs=pl.BlockSpec((tile,), lambda i: (i,)),
        ),
        compiler_params=_compiler_params(),
        cost_estimate=_cost(n, flat.dtype.itemsize),
    )(flat)


def _pick_tile_rows(rows, cols, itemsize, sub,
                    target_block_bytes=_TARGET_BLOCK_BYTES):
    # Biggest multiple-of-`sub` row count whose block is ~target_block_bytes ...
    tile_rows = (target_block_bytes // (cols * itemsize)) // sub * sub
    tile_rows = max(sub, tile_rows)
    # ... but never fewer than ~4 grid blocks when the input allows it, so
    # both v7x TensorCores get work and DMA/compute pipelining stays alive.
    quarter = max(sub, (pl.cdiv(rows, 4) // sub) * sub)
    tile_rows = min(tile_rows, quarter)
    if tile_rows >= rows:
        # Full extent is always a legal block dim (even if not multiple of sub).
        tile_rows = rows
    return tile_rows


def _pick_tile_1d(n, itemsize, target_block_bytes=_TARGET_BLOCK_BYTES):
    tile = (target_block_bytes // itemsize) // _CHUNK_1D * _CHUNK_1D
    tile = max(_CHUNK_1D, tile)
    quarter = max(_CHUNK_1D, (pl.cdiv(n, 4) // _CHUNK_1D) * _CHUNK_1D)
    tile = min(tile, quarter)
    if tile >= n:
        tile = n  # full extent — always legal
    return tile


def hsigmoid(x: jax.Array) -> jax.Array:
    """Elementwise hard-sigmoid matching PyTorch F.relu6(x + 3) / 6."""
    if not jnp.issubdtype(x.dtype, jnp.floating):
        raise TypeError(f"hsigmoid expects a floating dtype, got {x.dtype}")

    orig_shape = x.shape
    n = x.size
    itemsize = x.dtype.itemsize
    # dtype-aware sublane packing (f32:8, bf16/f16:16, fp8:32)
    sub = {4: 8, 2: 16, 1: 32}.get(itemsize, 8)

    if n % _LANE == 0:
        # Fast path: widest lane-dense slab width (multiple of 128, ≤ 4096)
        # that divides numel exactly; reshape is metadata-only (no HBM copy).
        cols = _LANE
        for c in range(4096, _LANE - 1, -_LANE):
            if n % c == 0:
                cols = c
                break
        rows = n // cols
        x2d = x.reshape(rows, cols)
        tile_rows = _pick_tile_rows(rows, cols, itemsize, sub)
        out2d = _run_2d(x2d, tile_rows, cols)
        return out2d.reshape(orig_shape)

    # Ragged fallback: run directly on the flat 1-D view with a cdiv grid;
    # Pallas masks the ragged last block — no pad / slice HBM round trips.
    flat = x.reshape(-1)
    tile = _pick_tile_1d(n, itemsize)
    out = _run_1d(flat, tile)
    return out.reshape(orig_shape)


def hsigmoid_ref(x):
    xf = x.astype(jnp.float32)
    return (jnp.clip(xf + 3.0, 0.0, 6.0) / 6.0).astype(x.dtype)


if __name__ == "__main__":
    key = jax.random.PRNGKey(0)
    # small NCHW input consistent with MobileNetV3 feature-map usage
    x = jax.random.normal(key, (2, 4, 16, 16), dtype=jnp.float32) * 4.0

    y = jax.block_until_ready(hsigmoid(x))
    y_ref = hsigmoid_ref(x)
    assert y.shape == x.shape and y.dtype == x.dtype
    assert jnp.allclose(y, y_ref, atol=1e-6, rtol=1e-6), "mismatch vs reference"

    # ragged / 1-D fallback path (numel not a multiple of 128)
    x2 = jax.random.normal(key, (3, 5, 7, 11), dtype=jnp.float32) * 4.0
    y2 = jax.block_until_ready(hsigmoid(x2))
    assert jnp.allclose(y2, hsigmoid_ref(x2), atol=1e-6, rtol=1e-6)

    # bf16 path (in-kernel f32 compute, cast back on store)
    x3 = (jax.random.normal(key, (2, 8, 16, 16), dtype=jnp.float32) * 4.0
          ).astype(jnp.bfloat16)
    y3 = jax.block_until_ready(hsigmoid(x3))
    assert y3.dtype == jnp.bfloat16
    assert jnp.allclose(y3.astype(jnp.float32),
                        hsigmoid_ref(x3).astype(jnp.float32),
                        atol=8e-3, rtol=8e-3)

    print("KERNEL_OK")
</pallas_src>

<mosaic_0001>
module attributes {stable_mosaic.version = 11 : i64} {
  func.func @_hsigmoid_kernel(%arg0: i32, %arg1: memref<1x2048xf32, #tpu.memory_space<vmem>>, %arg2: memref<1x2048xf32, #tpu.memory_space<vmem>>) attributes {dimension_semantics = [#tpu.dimension_semantics<parallel>], iteration_bounds = array<i64: 1>, scalar_prefetch = 0 : i64, scratch_operands = 0 : i64, tpu.core_type = #tpu.core_type<tc>, window_params = [{transform_indices = @transform_0, window_bounds = array<i64: 1, 2048>}, {transform_indices = @transform_1, window_bounds = array<i64: 1, 2048>}]} {
    %c0 = arith.constant 0 : index
    %c0_0 = arith.constant 0 : index
    %0 = vector.load %arg1[%c0, %c0_0] : memref<1x2048xf32, #tpu.memory_space<vmem>>, vector<1x2048xf32>
    %cst = arith.constant 3.000000e+00 : f32
    %1 = vector.broadcast %cst : f32 to vector<1x2048xf32>
    %2 = arith.addf %0, %1 : vector<1x2048xf32>
    %cst_1 = arith.constant 0.000000e+00 : f32
    %3 = vector.broadcast %cst_1 : f32 to vector<1x2048xf32>
    %4 = arith.maximumf %2, %3 : vector<1x2048xf32>
    %cst_2 = arith.constant 6.000000e+00 : f32
    %5 = vector.broadcast %cst_2 : f32 to vector<1x2048xf32>
    %6 = arith.minimumf %4, %5 : vector<1x2048xf32>
    %cst_3 = arith.constant 0.166666672 : f32
    %7 = vector.broadcast %cst_3 : f32 to vector<1x2048xf32>
    %8 = arith.mulf %6, %7 : vector<1x2048xf32>
    %c0_4 = arith.constant 0 : index
    %c0_5 = arith.constant 0 : index
    %9 = vector.load %arg2[%c0_4, %c0_5] : memref<1x2048xf32, #tpu.memory_space<vmem>>, vector<1x2048xf32>
    tpu.vector_store %arg2[%c0_4, %c0_5], %8 {strides = array<i32>} : memref<1x2048xf32, #tpu.memory_space<vmem>>, vector<1x2048xf32>,
    return
  }
  func.func @transform_0(%arg0: i32) -> (i32, i32) {
    %c0_i32 = arith.constant 0 : i32
    %c0_i32_0 = arith.constant 0 : i32
    return %arg0, %c0_i32 : i32, i32
  }
  func.func @transform_1(%arg0: i32) -> (i32, i32) {
    %c0_i32 = arith.constant 0 : i32
    %c0_i32_0 = arith.constant 0 : i32
    return %arg0, %c0_i32 : i32, i32
  }
}

</mosaic_0001>

<bundles_post_ra>
// kernel: tpu_custom_call.1
= control target key start
LH: loop header
LB: loop body
LE: loop exit
PB: predicated region body
PF: predicated region fallthrough
CT: control target
= control target key end

     0   :  { %6 = vsyncpa [#allocation3], 0  ;;  %s134_s0 = inlined_call_operand.hbm [shape: f32[1,2048], index: 0, kind: input, shape index: {}]   ;;  %s135_s1 = inlined_call_operand.hbm [shape: f32[1,2048], index: 1, kind: output, shape index: {}]  }
   0x1   :  { %7 = vsyncpa [#allocation4], 0  ;;  %s98_s6 = smov [#allocation2]   ;;  %s50_s10 = scalar_lea.hbm %s134_s0, 256 }
   0x2   :  { %s14_s7 = sshll.u32 %s98_s6, 4  ;;  %p51_p0 = scmp.ne.s32.totalorder %s134_s0, %s50_s10  ;;  %s15_s7 = int_to_ptr.vmem [resolvable:$true] %s14_s7 }
   0x3   :  { %p54_p1 = scmp.lt.u32.totalorder %s50_s10, %s134_s0 }
   0x5   :  { %p56_p2 = pnand %p54_p1, %p51_p0 }
   0x7   :  { %59 = shalt.err (!%p56_p2)
}
   0x8   :  { %s60_s15 = scalar_lea.vmem %s15_s7, 256  ;;  %p65_p4 = scmp.lt.s32.totalorder %s15_s7, %s15_s7 }
   0x9   :  { %p61_p3 = scmp.ne.s32.totalorder %s15_s7, %s60_s15  ;;  %p66_p5 = scmp.lt.s32.totalorder %s60_s15, %s60_s15 }
   0xb   :  { %p67_p6 = por %p66_p5, %p65_p4 }
   0xd   :  { %p68_p7 = pnand %p67_p6, %p61_p3 }
   0xf   :  { %71 = shalt.err (!%p68_p7)
}
  0x10   :  { %17 = dma.hbm_to_vmem [thread:$0]  %s134_s0, 256, %s15_s7, [#allocation3]  }
  0x11   :  { %94 = dma.done.wait [#allocation3], 256  }
  0x12   :  { %95 = vsyncadd [#allocation3], 4294967040  ;;  %v21_v0 = vld [vmem:[#allocation2] sm:$0xff]  ;;  %v22_v1 = vld [vmem:[#allocation2 + $0x8] sm:$0xff]  ;;  %s99_s18 = smov [#allocation5]  }
  0x13   :  { %v23_v2 = vadd.f32 3.0, %v21_v0  ;;  %v24_v3 = vadd.f32 3.0, %v22_v1  ;;  %s39_s19 = sshll.u32 %s99_s18, 4  ;;  %s40_s19 = int_to_ptr.vmem [resolvable:$true] %s39_s19 }
  0x14   :  { %s72_s20 = scalar_lea.vmem %s40_s19, 256  ;;  %p77_p9 = scmp.lt.s32.totalorder %s40_s19, %s40_s19 }
  0x15   :  { %v25_v4 = vmax.f32 %v23_v2, 0.0  ;;  %v26_v5 = vmax.f32 %v24_v3, 0.0  ;;  %p73_p8 = scmp.ne.s32.totalorder %s40_s19, %s72_s20  ;;  %p78_p10 = scmp.lt.s32.totalorder %s72_s20, %s72_s20 }
  0x17   :  { %v27_v6 = vmin.f32 %v25_v4, 6.0  ;;  %v28_v7 = vmin.f32 %v26_v5, 6.0  ;;  %p79_p11 = por %p78_p10, %p77_p9 }
  0x19   :  { %v29_v8 = vmul.f32 0.16666667, %v27_v6  ;;  %v30_v9 = vmul.f32 0.16666667, %v28_v7  ;;  %p80_p12 = pnand %p79_p11, %p73_p8 }
  0x1b   :  { %31 = vst [vmem:[#allocation5] sm:$0xff] %v29_v8  ;;  %32 = vst [vmem:[#allocation5 + $0x8] sm:$0xff] %v30_v9 }
  0x1c   :  { %83 = shalt.err (!%p80_p12)
}
  0x1d   :  { %s84_s22 = scalar_lea.hbm %s135_s1, 256 }
  0x1e   :  { %p85_p13 = scmp.ne.s32.totalorder %s135_s1, %s84_s22  ;;  %p88_p0 = scmp.lt.u32.totalorder %s84_s22, %s135_s1 }
  0x20   :  { %p90_p1 = pnand %p88_p0, %p85_p13 }
  0x22   :  { %93 = shalt.err (!%p90_p1)
}
  0x23   :  { %42 = dma.vmem_to_hbm [thread:$0]  %s40_s19, 256, %s135_s1, [#allocation4]  }
  0x24   :  { %96 = dma.done.wait [#allocation4], 256  }
  0x25   :  { %97 = vsyncadd [#allocation4], 4294967040 }
  0x26   :  { %46 = vsyncpa [#allocation3], 1 }
  0x27   :  { %47 = vsyncpa [#allocation4], 1 }

</bundles_post_ra>
